<compile_context>
chip_gen: v7x
topology: tpu7x:2x2x1
jax: 0.10.0
libtpu: 0.0.40
codegen_flags: <defaults>
</compile_context>

<pallas_src>
import functools

import jax
import jax.numpy as jnp
from jax.experimental import pallas as pl
from jax.experimental.pallas import tpu as pltpu


def _round_up(x, m):
    return ((x + m - 1) // m) * m


def _model_with_temperature_kernel(temp_ref, x_ref, w_ref, b_ref, o_ref, acc_ref):
    """Fused: logits = x @ w (K-tiled, f32 acc); out = (logits + b) / T.

    temp_ref : SMEM, (1,)              float32   (temperature)
    x_ref    : VMEM, [tb, tk]          bfloat16
    w_ref    : VMEM, [tk, N_pad]       bfloat16
    b_ref    : VMEM, [1, N_pad]        float32
    o_ref    : VMEM, [tb, N_pad]       float32
    acc_ref  : VMEM scratch [tb, N_pad] float32
    """
    k = pl.program_id(1)

    @pl.when(k == 0)
    def _init():
        acc_ref[...] = jnp.zeros_like(acc_ref)

    acc_ref[...] += jnp.dot(
        x_ref[...], w_ref[...], preferred_element_type=jnp.float32
    )

    @pl.when(k == pl.num_programs(1) - 1)
    def _finalize():
        # One scalar reciprocal + a VPU multiply instead of B*N divides.
        inv_t = 1.0 / temp_ref[0]
        o_ref[...] = ((acc_ref[...] + b_ref[...]) * inv_t).astype(o_ref.dtype)


def model_with_temperature_forward(
    x_nchw, weight_t, bias, temperature, *, block_b=512, block_k=512
):
    """JAX wrapper reproducing ModelWithTemperature.forward for a linear model.

    x_nchw      : [B, C, H, W]  float32
    weight_t    : [D, N]        float32   (torch Linear weight, transposed)
    bias        : [N]           float32
    temperature : python float or 0-d array
    """
    B = x_nchw.shape[0]
    D, N = weight_t.shape

    # Flatten NCHW -> [B, D] (same ordering as torch.flatten(x, 1)).
    x2d = x_nchw.reshape(B, D)

    # ----- padding / tiling plan -----------------------------------------
    # Lane-dense class dim: pad N up to a multiple of 128.
    n_pad = _round_up(max(N, 128), 128)
    # K (feature) tile: multiple of 128, capped at block_k; pad D to it.
    tk = min(block_k, _round_up(D, 128))
    d_pad = _round_up(D, tk)
    # Batch tile: multiple of 8 sublanes, capped at block_b; pad B to it.
    tb = min(block_b, _round_up(B, 8))
    b_pad = _round_up(B, tb)

    nb = b_pad // tb
    nk = d_pad // tk

    # bf16 inputs (f32 accumulation inside the kernel); zero padding is exact.
    x_p = jnp.pad(x2d.astype(jnp.bfloat16), ((0, b_pad - B), (0, d_pad - D)))
    w_p = jnp.pad(weight_t.astype(jnp.bfloat16), ((0, d_pad - D), (0, n_pad - N)))
    b_p = jnp.pad(bias.astype(jnp.float32), (0, n_pad - N)).reshape(1, n_pad)
    temp_arr = jnp.asarray([temperature], dtype=jnp.float32)

    cost = pl.CostEstimate(
        flops=2 * b_pad * d_pad * n_pad,
        transcendentals=0,
        bytes_accessed=(
            2 * b_pad * d_pad          # x (bf16)
            + 2 * d_pad * n_pad        # W (bf16)
            + 4 * n_pad                # bias (f32)
            + 4 * b_pad * n_pad        # output (f32)
        ),
    )

    out = pl.pallas_call(
        _model_with_temperature_kernel,
        out_shape=jax.ShapeDtypeStruct((b_pad, n_pad), jnp.float32),
        grid_spec=pltpu.PrefetchScalarGridSpec(
            num_scalar_prefetch=0,
            grid=(nb, nk),
            in_specs=[
                # temperature scalar, whole array in SMEM (untiled)
                pl.BlockSpec(memory_space=pltpu.MemorySpace.SMEM),
                # x: stream [tb, tk] tiles over (batch, K)
                pl.BlockSpec((tb, tk), lambda i, k: (i, k)),
                # W: [tk, n_pad] tile, resident across batch tiles
                pl.BlockSpec((tk, n_pad), lambda i, k: (k, 0)),
                # bias: single [1, n_pad] block
                pl.BlockSpec((1, n_pad), lambda i, k: (0, 0)),
            ],
            out_specs=pl.BlockSpec((tb, n_pad), lambda i, k: (i, 0)),
            scratch_shapes=[pltpu.VMEM((tb, n_pad), jnp.float32)],
        ),
        compiler_params=pltpu.CompilerParams(
            dimension_semantics=("parallel", "arbitrary"),
            vmem_limit_bytes=32 * 1024 * 1024,
        ),
        cost_estimate=cost,
    )(temp_arr, x_p, w_p, b_p)

    # Strip batch / class padding.
    return out[:B, :N]


if __name__ == "__main__":
    # Small shapes consistent with an image-classifier forward pass.
    B, C, H, W = 2, 4, 16, 16
    D = C * H * W          # 1024
    NUM_CLASSES = 10

    key = jax.random.PRNGKey(0)
    kx, kw, kb = jax.random.split(key, 3)

    # Deterministic synthetic inputs / parameters (no checkpoint loading).
    x = jax.random.normal(kx, (B, C, H, W), dtype=jnp.float32)
    # torch Linear weight is [N, D]; store transposed [D, N] for the kernel.
    weight_t = (jax.random.normal(kw, (NUM_CLASSES, D), dtype=jnp.float32) * 0.02).T
    bias = jax.random.normal(kb, (NUM_CLASSES,), dtype=jnp.float32) * 0.1

    temperature = 1.5  # e.g. after set_temperature(temp=1.5); default init is 1.0

    fwd = jax.jit(model_with_temperature_forward)
    out = fwd(x, weight_t, bias, temperature)
    out = jax.block_until_ready(out)
    assert out.shape == (B, NUM_CLASSES)

    # Pure-JAX reference with the same bf16-input / f32-accumulate numerics.
    x_bf = x.reshape(B, D).astype(jnp.bfloat16).astype(jnp.float32)
    w_bf = weight_t.astype(jnp.bfloat16).astype(jnp.float32)
    ref_bf16 = (x_bf @ w_bf + bias[None, :]) / temperature
    assert jnp.allclose(out, ref_bf16, atol=1e-3, rtol=1e-3), "mismatch vs bf16 reference"

    # Sanity check against the full-f32 PyTorch-semantics reference.
    ref_f32 = (x.reshape(B, D) @ weight_t + bias[None, :]) / temperature
    assert jnp.allclose(out, ref_f32, atol=5e-2, rtol=5e-2), "mismatch vs f32 reference"

    print("KERNEL_OK")
</pallas_src>

<mosaic_0001>
module attributes {stable_mosaic.version = 11 : i64} {
  func.func @_model_with_temperature_kernel(%arg0: i32, %arg1: i32, %arg2: memref<1xf32, #tpu.memory_space<smem>>, %arg3: memref<8x512xbf16, #tpu.memory_space<vmem>>, %arg4: memref<512x128xbf16, #tpu.memory_space<vmem>>, %arg5: memref<1x128xf32, #tpu.memory_space<vmem>>, %arg6: memref<8x128xf32, #tpu.memory_space<vmem>>, %arg7: memref<8x128xf32, #tpu.memory_space<vmem>>) attributes {dimension_semantics = [#tpu.dimension_semantics<parallel>, #tpu.dimension_semantics<arbitrary>], iteration_bounds = array<i64: 1, 2>, scalar_prefetch = 0 : i64, scratch_operands = 1 : i64, tpu.core_type = #tpu.core_type<tc>, window_params = [{transform_indices = @transform_0, window_bounds = array<i64: 1>}, {transform_indices = @transform_1, window_bounds = array<i64: 8, 512>}, {transform_indices = @transform_2, window_bounds = array<i64: 512, 128>}, {pipeline_mode = #tpu.pipeline_mode<synchronous>, transform_indices = @transform_3, window_bounds = array<i64: 1, 128>}, {transform_indices = @transform_4, window_bounds = array<i64: 8, 128>}]} {
    %c0_i32 = arith.constant 0 : i32
    %0 = arith.cmpi eq, %arg1, %c0_i32 : i32
    %1 = arith.extui %0 : i1 to i32
    %c0_i32_0 = arith.constant 0 : i32
    %2 = arith.cmpi ne, %1, %c0_i32_0 : i32
    scf.if %2 {
      %cst_9 = arith.constant 0.000000e+00 : f32
      %12 = vector.broadcast %cst_9 : f32 to vector<8x128xf32>
      %c0_10 = arith.constant 0 : index
      %c0_11 = arith.constant 0 : index
      %13 = vector.load %arg7[%c0_10, %c0_11] : memref<8x128xf32, #tpu.memory_space<vmem>>, vector<8x128xf32>
      tpu.vector_store %arg7[%c0_10, %c0_11], %12 {strides = array<i32>} : memref<8x128xf32, #tpu.memory_space<vmem>>, vector<8x128xf32>,
    } else {
    }
    %c0 = arith.constant 0 : index
    %c0_1 = arith.constant 0 : index
    %3 = vector.load %arg7[%c0, %c0_1] : memref<8x128xf32, #tpu.memory_space<vmem>>, vector<8x128xf32>
    %c0_2 = arith.constant 0 : index
    %c0_3 = arith.constant 0 : index
    %4 = vector.load %arg3[%c0_2, %c0_3] : memref<8x512xbf16, #tpu.memory_space<vmem>>, vector<8x512xbf16>
    %c0_4 = arith.constant 0 : index
    %c0_5 = arith.constant 0 : index
    %5 = vector.load %arg4[%c0_4, %c0_5] : memref<512x128xbf16, #tpu.memory_space<vmem>>, vector<512x128xbf16>
    %cst = arith.constant dense<0.000000e+00> : vector<8x128xf32>
    %6 = tpu.matmul %4, %5, %cst {dimension_numbers = #tpu.dot_dimension_numbers<[1], [0], [0], [1], [0, 0, 1, 1], [], []>} : vector<8x512xbf16>, vector<512x128xbf16>, vector<8x128xf32> -> vector<8x128xf32>
    %7 = arith.addf %3, %6 : vector<8x128xf32>
    %c0_6 = arith.constant 0 : index
    %c0_7 = arith.constant 0 : index
    %8 = vector.load %arg7[%c0_6, %c0_7] : memref<8x128xf32, #tpu.memory_space<vmem>>, vector<8x128xf32>
    tpu.vector_store %arg7[%c0_6, %c0_7], %7 {strides = array<i32>} : memref<8x128xf32, #tpu.memory_space<vmem>>, vector<8x128xf32>,
    %c1_i32 = arith.constant 1 : i32
    %9 = arith.cmpi eq, %arg1, %c1_i32 : i32
    %10 = arith.extui %9 : i1 to i32
    %c0_i32_8 = arith.constant 0 : i32
    %11 = arith.cmpi ne, %10, %c0_i32_8 : i32
    scf.if %11 {
      %c0_9 = arith.constant 0 : index
      %12 = memref.load %arg2[%c0_9] : memref<1xf32, #tpu.memory_space<smem>>
      %cst_10 = arith.constant 1.000000e+00 : f32
      %13 = arith.divf %cst_10, %12 : f32
      %c0_11 = arith.constant 0 : index
      %c0_12 = arith.constant 0 : index
      %14 = vector.load %arg7[%c0_11, %c0_12] : memref<8x128xf32, #tpu.memory_space<vmem>>, vector<8x128xf32>
      %c0_13 = arith.constant 0 : index
      %c0_14 = arith.constant 0 : index
      %15 = vector.load %arg5[%c0_13, %c0_14] : memref<1x128xf32, #tpu.memory_space<vmem>>, vector<1x128xf32>
      %16 = vector.broadcast %15 : vector<1x128xf32> to vector<8x128xf32>
      %17 = arith.addf %14, %16 : vector<8x128xf32>
      %18 = vector.broadcast %13 : f32 to vector<8x128xf32>
      %19 = arith.mulf %17, %18 : vector<8x128xf32>
      %c0_15 = arith.constant 0 : index
      %c0_16 = arith.constant 0 : index
      %20 = vector.load %arg6[%c0_15, %c0_16] : memref<8x128xf32, #tpu.memory_space<vmem>>, vector<8x128xf32>
      tpu.vector_store %arg6[%c0_15, %c0_16], %19 {strides = array<i32>} : memref<8x128xf32, #tpu.memory_space<vmem>>, vector<8x128xf32>,
    } else {
    }
    return
  }
  func.func @transform_0(%arg0: i32, %arg1: i32) -> i32 {
    %c0_i32 = arith.constant 0 : i32
    %c0_i32_0 = arith.constant 0 : i32
    return %c0_i32 : i32
  }
  func.func @transform_1(%arg0: i32, %arg1: i32) -> (i32, i32) {
    %c0_i32 = arith.constant 0 : i32
    return %arg0, %arg1 : i32, i32
  }
  func.func @transform_2(%arg0: i32, %arg1: i32) -> (i32, i32) {
    %c0_i32 = arith.constant 0 : i32
    %c0_i32_0 = arith.constant 0 : i32
    return %arg1, %c0_i32 : i32, i32
  }
  func.func @transform_3(%arg0: i32, %arg1: i32) -> (i32, i32) {
    %c0_i32 = arith.constant 0 : i32
    %c0_i32_0 = arith.constant 0 : i32
    %c0_i32_1 = arith.constant 0 : i32
    return %c0_i32, %c0_i32_0 : i32, i32
  }
  func.func @transform_4(%arg0: i32, %arg1: i32) -> (i32, i32) {
    %c0_i32 = arith.constant 0 : i32
    %c0_i32_0 = arith.constant 0 : i32
    return %arg0, %c0_i32 : i32, i32
  }
}

</mosaic_0001>

<bundles_post_ra>
// kernel: model_with_temperature_forward.1
= control target key start
LH: loop header
LB: loop body
LE: loop exit
PB: predicated region body
PF: predicated region fallthrough
CT: control target
= control target key end

     0   :  { %s917_s17 = smov 0   ;;  %s919_s18 = smov 0   ;;  %s1000_s0 = inlined_call_operand.<no memory space> [shape: f32[1], index: 0, kind: input, shape index: {}]   ;;  %s1001_s1 = inlined_call_operand.vmem [shape: bf16[8,1024], index: 1, kind: input, shape index: {}]   ;;  %s1002_s2 = inlined_call_operand.vmem [shape: bf16[1024,128], index: 2, kind: input, shape index: {}]   ;;  %s1003_s3 = inlined_call_operand.vmem [shape: f32[1,128], index: 3, kind: input, shape index: {}]   ;;  %s1004_s4 = inlined_call_operand.vmem [shape: f32[8,128], index: 4, kind: output, shape index: {}]  }
   0x1   :  { %9 = sst [smem:[#allocation3]] %s1000_s0  ;;  %s921_s19 = smov 0  }
   0x2 LB: > { %s24_s0 = sadd.s32 1, %s882_s18  ;;  %p708_p0 = scmp.ge.s32.totalorder %s886_s19, 1  ;;  %s886_s19 = sphi %s921_s19, %s15_s19   ;;  %s882_s18 = sphi %s919_s18, %s1006_s18   ;;  %s878_s17 = sphi %s917_s17, %s1005_s17  }
   0x3   : > { %p25_p1 = scmp.ge.s32.totalorder %s24_s0, 2  ;;  %p193_p2 = scmp.lt.s32.totalorder %s886_s19, 3 }
   0x5   : > { %s1008_s0 = smov (%p25_p1, %s24_s0), 0  ;;  %p194_p3 = pnand %p708_p0, %p193_p2 }
   0x6   : > { %s709_s20 = sshll.u32 (!%p194_p3), %s878_s17, 2  ;;  %s711_s21 = sshll.u32 (!%p194_p3), %s878_s17, 6 }
   0x7   : > { %197 = sbr.rel (%p194_p3) target bundleno = 291 (0x123), region = 36  ;;  %p230_p4 = scmp.lt.s32.totalorder (!%p194_p3), %s709_s20, 7 }
   0x8   : > { %p238_p5 = scmp.lt.s32.totalorder (!%p194_p3), %s711_s21, 127  ;;  %p713_p6 = scmp.ne.s32.totalorder (!%p194_p3), %s878_s17, 0 }
   0xe   : > { %s1010_s20 = smov (!%p230_p4, %s709_s20), 7  ;;  %s1012_s21 = smov (!%p238_p5, %s711_s21), 127 }
   0xf   : > { %s710_s22 = sshll.u32 %s1010_s20, 2  ;;  %s712_s26 = sshll.u32 %s1012_s21, 2  ;;  %v888_v0 = vmov (!%p713_p6), 0.0  }
  0x10   : > { %s942_s25 = scalar_lea.vmem %s1001_s1, %s710_s22  ;;  %s947_s29 = scalar_lea.vmem %s1002_s2, %s712_s26  ;;  %252 = vst [vmem:[#allocation2] sm:$0xff] (!%p713_p6), %v888_v0 }
  0x11   : > { %251 = sbr.rel (%p713_p6) target bundleno = 24 (0x18), region = 40 }
  0x18 PF: > { %v826_v1 = vld [vmem:[%s947_s29 + $0x40] sm:$0xff]   ;;  %v830_v5 = vld [vmem:[%s947_s29 + $0x48] sm:$0xff]   ;;  %v834_v9 = vld [vmem:[%s947_s29 + $0x50] sm:$0xff]   ;;  %p750_p7 = scmp.ne.s32.totalorder %s878_s17, 1 }
  0x19   : > { %v827_v2 = vld [vmem:[%s947_s29 + $0xc0] sm:$0xff]   ;;  %755 = vmatprep.subr.bf16.mxu0 %v826_v1  ;;  %v831_v6 = vld [vmem:[%s947_s29 + $0xc8] sm:$0xff]   ;;  %v835_v10 = vld [vmem:[%s947_s29 + $0xd0] sm:$0xff]   ;;  %s612_s30 = sld [smem:[#allocation3]] (!%p750_p7) }
  0x1a   : > { %v828_v3 = vld [vmem:[%s947_s29] sm:$0xff]   ;;  %777 = vmatprep.subr.bf16.mxu1 %v827_v2  ;;  %v832_v7 = vld [vmem:[%s947_s29 + $0x8] sm:$0xff]   ;;  %v836_v11 = vld [vmem:[%s947_s29 + $0x10] sm:$0xff]  }
  0x1b   : > { %v829_v4 = vld [vmem:[%s947_s29 + $0x80] sm:$0xff]   ;;  %756 = vmatpush3.bf16.msra.mxu0 %v828_v3  ;;  %v833_v8 = vld [vmem:[%s947_s29 + $0x88] sm:$0xff]   ;;  %v837_v12 = vld [vmem:[%s947_s29 + $0x90] sm:$0xff]  }
  0x1c   : > { %778 = vmatpush3.bf16.msra.mxu1 %v829_v4  ;;  %757 = vmatprep.subr.bf16.mxu0 %v830_v5  ;;  %v838_v13 = vld [vmem:[%s947_s29 + $0x58] sm:$0xff]   ;;  %v842_v17 = vld [vmem:[%s947_s29 + $0x60] sm:$0xff]   ;;  %v846_v21 = vld [vmem:[%s947_s29 + $0x68] sm:$0xff]  }
  0x1d   : > { %779 = vmatprep.subr.bf16.mxu1 %v831_v6  ;;  %v839_v14 = vld [vmem:[%s947_s29 + $0xd8] sm:$0xff]   ;;  %v843_v18 = vld [vmem:[%s947_s29 + $0xe0] sm:$0xff]   ;;  %v847_v22 = vld [vmem:[%s947_s29 + $0xe8] sm:$0xff]  }
  0x1e   : > { %v840_v15 = vld [vmem:[%s947_s29 + $0x18] sm:$0xff]   ;;  %v844_v19 = vld [vmem:[%s947_s29 + $0x20] sm:$0xff]   ;;  %v848_v23 = vld [vmem:[%s947_s29 + $0x28] sm:$0xff]  }
  0x1f   : > { %758 = vmatpush3.bf16.msra.mxu0 %v832_v7  ;;  %v841_v16 = vld [vmem:[%s947_s29 + $0x98] sm:$0xff]   ;;  %v845_v20 = vld [vmem:[%s947_s29 + $0xa0] sm:$0xff]   ;;  %v849_v24 = vld [vmem:[%s947_s29 + $0xa8] sm:$0xff]   ;;  %v613_v52 = vstv (!%p750_p7), %s612_s30 }
  0x20   : > { %780 = vmatpush3.bf16.msra.mxu1 %v833_v8  ;;  %759 = vmatprep.subr.bf16.mxu0 %v834_v9  ;;  %v850_v25 = vld [vmem:[%s947_s29 + $0x70] sm:$0xff]   ;;  %v854_v29 = vld [vmem:[%s947_s29 + $0x78] sm:$0xff]   ;;  %v254_v33 = vld [vmem:[%s942_s25] sm:$0xff]  ;;  %862 = vrcp.f32 (!%p750_p7), %v613_v52 }
  0x21   : > { %781 = vmatprep.subr.bf16.mxu1 %v835_v10  ;;  %v851_v26 = vld [vmem:[%s947_s29 + $0xf0] sm:$0xff]   ;;  %v855_v30 = vld [vmem:[%s947_s29 + $0xf8] sm:$0xff]   ;;  %v255_v34 = vld [vmem:[%s942_s25 + $0x8] sm:$0xff]  ;;  %v714_v35 = vcombine.low %v254_v33, %v254_v33  ;;  %v715_v36 = vcombine.high %v254_v33, %v254_v33 }
  0x22   : > { %v852_v27 = vld [vmem:[%s947_s29 + $0x30] sm:$0xff]   ;;  %v856_v31 = vld [vmem:[%s947_s29 + $0x38] sm:$0xff]   ;;  %v716_v37 = vcombine.low %v255_v34, %v255_v34  ;;  %v717_v38 = vcombine.high %v255_v34, %v255_v34  ;;  %v253_v47 = vld [vmem:[#allocation2] sm:$0xff] }
  0x23   : > { %760 = vmatpush3.bf16.msra.mxu0 %v836_v11  ;;  %v853_v28 = vld [vmem:[%s947_s29 + $0xb0] sm:$0xff]   ;;  %v857_v32 = vld [vmem:[%s947_s29 + $0xb8] sm:$0xff]   ;;  %558 = vmatprep.mubr.bf16.mxu0 %v715_v36  ;;  %v751_v55 = vld [vmem:[%s1003_s3] ss:$0 sm:$0xff] (!%p750_p7) }
  0x24   : > { %782 = vmatpush3.bf16.msra.mxu1 %v837_v12  ;;  %761 = vmatprep.subr.bf16.mxu0 %v838_v13 }
  0x25   : > { %783 = vmatprep.subr.bf16.mxu1 %v839_v14  ;;  %598 = vmatprep.mubr.bf16.mxu1 %v717_v38 }
  0x27   : > { %762 = vmatpush3.bf16.msra.mxu0 %v840_v15 }
  0x28   : > { %784 = vmatpush3.bf16.msra.mxu1 %v841_v16  ;;  %763 = vmatprep.subr.bf16.mxu0 %v842_v17 }
  0x29   : > { %785 = vmatprep.subr.bf16.mxu1 %v843_v18 }
  0x2a   : > { %v863_v53 = vpop.eup (!%p750_p7), %862 }
  0x2b   : > { %764 = vmatpush3.bf16.msra.mxu0 %v844_v19  ;;  %799 = vpush (!%p750_p7), %v863_v53 }
  0x2c   : > { %786 = vmatpush3.bf16.msra.mxu1 %v845_v20  ;;  %765 = vmatprep.subr.bf16.mxu0 %v846_v21 }
  0x2d   : > { %787 = vmatprep.subr.bf16.mxu1 %v847_v22 }
  0x2f   : > { %766 = vmatpush3.bf16.msra.mxu0 %v848_v23 }
  0x30   : > { %788 = vmatpush3.bf16.msra.mxu1 %v849_v24  ;;  %767 = vmatprep.subr.bf16.mxu0 %v850_v25 }
  0x31   : > { %789 = vmatprep.subr.bf16.mxu1 %v851_v26 }
  0x33   : > { %768 = vmatpush3.bf16.msra.mxu0 %v852_v27 }
  0x34   : > { %790 = vmatpush3.bf16.msra.mxu1 %v853_v28  ;;  %769 = vmatprep.subr.bf16.mxu0 %v854_v29 }
  0x35   : > { %791 = vmatprep.subr.bf16.mxu1 %v855_v30 }
  0x37   : > { %770 = vmatpush3.bf16.msra.mxu0 %v856_v31 }
  0x38   : > { %792 = vmatpush3.bf16.msra.mxu1 %v857_v32 }
  0x3a   : > { %559 = vmatmul.mubr.bf16.vlgmr.msra.gmra.mrb[0].mxu0 %v714_v35 }
  0x3b   : > { %599 = vmatmul.mubr.bf16.vlgmr.msra.gmra.mrb[0].mxu1 %v716_v37 }
  0x5c   : > { %s800_s7 = spop (!%p750_p7), %799 }
  0x5d   : > { %v625_v57 = vstv (!%p750_p7), %s800_s7 }
 0x10d   : > { %v771_v39 = vpop.f32.mrb[0].mxu0 }
 0x10e   : > { %v793_v40 = vpop.f32.mrb[0].mxu1  ;;  %v772_v41 = vpop.f32.mrb[1].mxu0 }
 0x10f   : > { %v794_v42 = vpop.f32.mrb[1].mxu1  ;;  %v773_v43 = vadd.f32 %v772_v41, %v771_v39  ;;  %v774_v45 = vpop.f32.mrb[2].mxu0 }
 0x110   : > { %v795_v44 = vadd.f32 %v794_v42, %v793_v40  ;;  %v796_v46 = vpop.f32.mrb[2].mxu1  ;;  %v775_v48 = vpop.f32.mrb[3].mxu0  ;;  %611 = sbr.rel (%p750_p7) target bundleno = 291 (0x123), region = 44 }
 0x111   : > { %v797_v49 = vpop.f32.mrb[3].mxu1 }
 0x112   : > { %v601_v50 = vadd.f32 %v795_v44, %v773_v43 }
 0x114   : > { %v606_v51 = vadd.f32 %v601_v50, %v253_v47 }
 0x116   : > { %607 = vst [vmem:[#allocation2] sm:$0xff] %v606_v51 }
 0x11d   : > { %v616_v54 = vld [vmem:[#allocation2] sm:$0xff] }
 0x11e   : > { %v624_v56 = vadd.f32 %v751_v55, %v616_v54 }
 0x120   : > { %v626_v58 = vmul.f32 %v625_v57, %v624_v56 }
 0x122   : > { %627 = vst [vmem:[%s1004_s4] sm:$0xff] %v626_v58 }
 0x123 PF: > { %s15_s19 = sadd.s32 1, %s886_s19   ;;  %s1005_s17 = smov %s882_s18 }
 0x124   : > { %p12_p8 = scmp.ge.s32.totalorder %s15_s19, 4   ;;  %s1006_s18 = smov %s1008_s0 }
 0x126   :  { %14 = sbr.rel (!%p12_p8) target bundleno = 2 (0x2), region = 77 }

</bundles_post_ra>
